<compile_context>
chip_gen: v5e
topology: v5e:2x2
jax: 0.10.0
libtpu: 0.0.40
codegen_flags: <defaults>
</compile_context>

<pallas_src>
import functools

import jax
import jax.numpy as jnp
from jax.experimental import pallas as pl
from jax.experimental.pallas import tpu as pltpu

# ----- synthetic (small) Camembert config -----
VOCAB = 100
HIDDEN = 32
N_HEADS = 2
HEAD_DIM = HIDDEN // N_HEADS
INTERMEDIATE = 64
N_LAYERS = 2
MAX_POS = 64
NUM_LABELS = 5
LABEL_PAD = 128                  # lane-dense classifier width (sliced outside)
LN_EPS = 1e-5
PAD_IDX = 1                      # camembert / roberta padding idx
MAX_ROW_TILE = 512               # token-row tile cap for [B*S, H] slabs
VMEM_LIMIT = 32 * 1024 * 1024    # scoped-VMEM budget safe on v5e/v6e/v7x


def _row_tile(m):
    """Largest 8-aligned row tile <= MAX_ROW_TILE that evenly divides m."""
    t = min(m, MAX_ROW_TILE)
    while m % t:
        t -= 8
    return max(t, 8)


def _mosaic():
    return pltpu.CompilerParams(
        dimension_semantics=("parallel",),
        vmem_limit_bytes=VMEM_LIMIT,
    )


def _layernorm_f32(y, g, b):
    mu = jnp.mean(y, axis=-1, keepdims=True)
    var = jnp.mean(jnp.square(y - mu), axis=-1, keepdims=True)
    inv = jax.lax.rsqrt(var + LN_EPS)
    return (y - mu) * inv * g + b


def _gelu_f32(y):
    # TODO(synk): HF camembert uses exact (erf) GELU; tanh approximation here.
    return 0.5 * y * (1.0 + jnp.tanh(0.7978845608028654 * (y + 0.044715 * y * y * y)))


# ---------------- Pallas kernels ----------------

def _emb_layernorm_kernel(x_ref, g_ref, b_ref, o_ref):
    y = x_ref[...].astype(jnp.float32)
    o_ref[...] = _layernorm_f32(y, g_ref[...], b_ref[...]).astype(o_ref.dtype)


def embed_layernorm(x, gamma, beta):
    """LayerNorm over hidden dim (no residual). x:[M,H] f32 -> [M,H] bf16."""
    M, H = x.shape
    T = _row_tile(M)
    return pl.pallas_call(
        _emb_layernorm_kernel,
        out_shape=jax.ShapeDtypeStruct((M, H), jnp.bfloat16),
        grid_spec=pltpu.PrefetchScalarGridSpec(
            num_scalar_prefetch=0,
            grid=(M // T,),
            in_specs=[
                pl.BlockSpec((T, H), lambda i: (i, 0)),
                pl.BlockSpec((1, H), lambda i: (0, 0)),
                pl.BlockSpec((1, H), lambda i: (0, 0)),
            ],
            out_specs=pl.BlockSpec((T, H), lambda i: (i, 0)),
        ),
        compiler_params=_mosaic(),
    )(x, gamma.reshape(1, H), beta.reshape(1, H))


def _attn_block_kernel(x_ref, wqkv_ref, bqkv_ref, wo_ref, bo_ref, mask_ref,
                       g_ref, b_ref, o_ref, *, n_heads, head_dim):
    """Fused: QKV proj + multi-head softmax attention + out proj + add&LN.

    Operates on one batch element: x_ref block is [1, S, H]."""
    h_all = n_heads * head_dim
    x_bf = x_ref[0]                                   # [S, H] bf16
    x = x_bf.astype(jnp.float32)
    mask = mask_ref[0]                                # [1, S] additive f32

    # fused QKV projection: one [S,H] x [H,3H] bf16 matmul, f32 accumulate
    qkv = jnp.dot(x_bf, wqkv_ref[...],
                  preferred_element_type=jnp.float32) + bqkv_ref[...]   # [S, 3H]

    scale = 1.0 / (head_dim ** 0.5)
    ctx_heads = []
    for h in range(n_heads):                          # static unroll, n_heads tiny
        lo = h * head_dim
        qh = qkv[:, lo:lo + head_dim].astype(jnp.bfloat16)
        kh = qkv[:, h_all + lo:h_all + lo + head_dim].astype(jnp.bfloat16)
        vh = qkv[:, 2 * h_all + lo:2 * h_all + lo + head_dim].astype(jnp.bfloat16)
        # scores: q @ k^T via dot_general (contract head_dim of both operands)
        s = jax.lax.dot_general(qh, kh, (((1,), (1,)), ((), ())),
                                preferred_element_type=jnp.float32)
        s = s * scale + mask                          # [S, S] f32
        m = jnp.max(s, axis=-1, keepdims=True)
        p = jnp.exp(s - m)
        p = p / jnp.sum(p, axis=-1, keepdims=True)    # softmax in f32
        ctx_heads.append(jnp.dot(p.astype(jnp.bfloat16), vh,
                                 preferred_element_type=jnp.float32))
    ctx = jnp.concatenate(ctx_heads, axis=-1)         # [S, H] f32

    attn = jnp.dot(ctx.astype(jnp.bfloat16), wo_ref[...],
                   preferred_element_type=jnp.float32) + bo_ref[...]
    y = attn + x                                      # residual, f32
    o_ref[0] = _layernorm_f32(y, g_ref[...], b_ref[...]).astype(o_ref.dtype)


def attention_block(x3, wqkv, bqkv, wo, bo, add_mask, gamma, beta):
    B, S, H = x3.shape
    H3 = wqkv.shape[1]
    return pl.pallas_call(
        functools.partial(_attn_block_kernel, n_heads=N_HEADS, head_dim=HEAD_DIM),
        out_shape=jax.ShapeDtypeStruct((B, S, H), jnp.bfloat16),
        grid_spec=pltpu.PrefetchScalarGridSpec(
            num_scalar_prefetch=0,
            grid=(B,),
            in_specs=[
                pl.BlockSpec((1, S, H), lambda b: (b, 0, 0)),
                pl.BlockSpec((H, H3), lambda b: (0, 0)),
                pl.BlockSpec((1, H3), lambda b: (0, 0)),
                pl.BlockSpec((H, H), lambda b: (0, 0)),
                pl.BlockSpec((1, H), lambda b: (0, 0)),
                pl.BlockSpec((1, 1, S), lambda b: (b, 0, 0)),
                pl.BlockSpec((1, H), lambda b: (0, 0)),
                pl.BlockSpec((1, H), lambda b: (0, 0)),
            ],
            out_specs=pl.BlockSpec((1, S, H), lambda b: (b, 0, 0)),
        ),
        compiler_params=_mosaic(),
    )(x3, wqkv, bqkv.reshape(1, H3), wo, bo.reshape(1, H),
      add_mask, gamma.reshape(1, H), beta.reshape(1, H))


def _ffn_block_kernel(x_ref, w1_ref, b1_ref, w2_ref, b2_ref, g_ref, b_ref, o_ref):
    """Fused: w1 + GELU + w2 + residual + LayerNorm on a row tile of [M,H]."""
    x_bf = x_ref[...]                                 # [T, H] bf16
    x = x_bf.astype(jnp.float32)
    h = jnp.dot(x_bf, w1_ref[...],
                preferred_element_type=jnp.float32) + b1_ref[...]       # [T, I]
    h = _gelu_f32(h)
    y = jnp.dot(h.astype(jnp.bfloat16), w2_ref[...],
                preferred_element_type=jnp.float32) + b2_ref[...]       # [T, H]
    y = y + x
    o_ref[...] = _layernorm_f32(y, g_ref[...], b_ref[...]).astype(o_ref.dtype)


def ffn_block(x, w1, b1, w2, b2, gamma, beta):
    M, H = x.shape
    I = w1.shape[1]
    T = _row_tile(M)
    return pl.pallas_call(
        _ffn_block_kernel,
        out_shape=jax.ShapeDtypeStruct((M, H), jnp.bfloat16),
        grid_spec=pltpu.PrefetchScalarGridSpec(
            num_scalar_prefetch=0,
            grid=(M // T,),
            in_specs=[
                pl.BlockSpec((T, H), lambda i: (i, 0)),
                pl.BlockSpec((H, I), lambda i: (0, 0)),
                pl.BlockSpec((1, I), lambda i: (0, 0)),
                pl.BlockSpec((I, H), lambda i: (0, 0)),
                pl.BlockSpec((1, H), lambda i: (0, 0)),
                pl.BlockSpec((1, H), lambda i: (0, 0)),
                pl.BlockSpec((1, H), lambda i: (0, 0)),
            ],
            out_specs=pl.BlockSpec((T, H), lambda i: (i, 0)),
        ),
        compiler_params=_mosaic(),
    )(x, w1, b1.reshape(1, I), w2, b2.reshape(1, H),
      gamma.reshape(1, H), beta.reshape(1, H))


def _classifier_kernel(x_ref, w_ref, b_ref, o_ref):
    o_ref[...] = (jnp.dot(x_ref[...], w_ref[...],
                          preferred_element_type=jnp.float32) + b_ref[...])


def classifier(x, w_pad, b_pad):
    """Lane-padded classifier: x:[M,H] bf16 @ w_pad:[H,128] -> [M,128] f32."""
    M, H = x.shape
    L = w_pad.shape[1]
    T = _row_tile(M)
    return pl.pallas_call(
        _classifier_kernel,
        out_shape=jax.ShapeDtypeStruct((M, L), jnp.float32),
        grid_spec=pltpu.PrefetchScalarGridSpec(
            num_scalar_prefetch=0,
            grid=(M // T,),
            in_specs=[
                pl.BlockSpec((T, H), lambda i: (i, 0)),
                pl.BlockSpec((H, L), lambda i: (0, 0)),
                pl.BlockSpec((1, L), lambda i: (0, 0)),
            ],
            out_specs=pl.BlockSpec((T, L), lambda i: (i, 0)),
        ),
        compiler_params=_mosaic(),
    )(x, w_pad, b_pad.reshape(1, L))


def _ce_kernel(logits_ref, labels_ref, loss_ref, *, num_labels):
    logits = logits_ref[...]                 # [N, 128] f32 (lane-padded)
    labels = labels_ref[...]                 # [N, 1] i32
    cols = jax.lax.broadcasted_iota(jnp.int32, logits.shape, 1)
    logits = jnp.where(cols < num_labels, logits, -1e30)   # mask pad lanes
    m = jnp.max(logits, axis=-1, keepdims=True)
    z = logits - m
    lse = jnp.log(jnp.sum(jnp.exp(z), axis=-1, keepdims=True))
    logp = z - lse
    onehot = (cols == labels).astype(jnp.float32)
    nll = -jnp.sum(onehot * logp, axis=-1, keepdims=True)   # [N, 1]
    valid = (labels != -100).astype(jnp.float32)
    total = jnp.sum(nll * valid)
    count = jnp.sum(valid)
    # NOTE: returns 0 (not NaN like torch) if every label is -100.
    loss_ref[...] = jnp.reshape(total / jnp.maximum(count, 1.0), (1, 1))


def cross_entropy(logits_pad, labels_1d):
    """Mean CE over labels != -100 (matches nn.CrossEntropyLoss(ignore_index=-100))."""
    N = logits_pad.shape[0]
    vmem = pl.BlockSpec(memory_space=pltpu.MemorySpace.VMEM)
    loss = pl.pallas_call(
        functools.partial(_ce_kernel, num_labels=NUM_LABELS),
        out_shape=jax.ShapeDtypeStruct((1, 1), jnp.float32),
        in_specs=[vmem, vmem],
        out_specs=vmem,
    )(logits_pad, labels_1d.reshape(N, 1).astype(jnp.int32))
    return loss[0, 0]


# ---------------- parameters (deterministic, synthetic) ----------------

def init_params(key):
    keys = iter(jax.random.split(key, 256))

    def w(shape):
        return 0.02 * jax.random.normal(next(keys), shape, jnp.float32)

    params = {
        "word_emb": w((VOCAB, HIDDEN)),
        "pos_emb": w((MAX_POS, HIDDEN)),
        "type_emb": w((1, HIDDEN)),
        "emb_ln_g": jnp.ones((HIDDEN,), jnp.float32),
        "emb_ln_b": jnp.zeros((HIDDEN,), jnp.float32),
        "layers": [],
    }
    for _ in range(N_LAYERS):
        wq, wk, wv = w((HIDDEN, HIDDEN)), w((HIDDEN, HIDDEN)), w((HIDDEN, HIDDEN))
        params["layers"].append({
            # fused [H, 3H] QKV weight, bf16 MXU operands
            "wqkv": jnp.concatenate([wq, wk, wv], axis=1).astype(jnp.bfloat16),
            "bqkv": jnp.zeros((3 * HIDDEN,), jnp.float32),
            "wo": w((HIDDEN, HIDDEN)).astype(jnp.bfloat16),
            "bo": jnp.zeros((HIDDEN,), jnp.float32),
            "attn_ln_g": jnp.ones((HIDDEN,), jnp.float32),
            "attn_ln_b": jnp.zeros((HIDDEN,), jnp.float32),
            "w1": w((HIDDEN, INTERMEDIATE)).astype(jnp.bfloat16),
            "b1": jnp.zeros((INTERMEDIATE,), jnp.float32),
            "w2": w((INTERMEDIATE, HIDDEN)).astype(jnp.bfloat16),
            "b2": jnp.zeros((HIDDEN,), jnp.float32),
            "ffn_ln_g": jnp.ones((HIDDEN,), jnp.float32),
            "ffn_ln_b": jnp.zeros((HIDDEN,), jnp.float32),
        })
    # classifier, zero-padded to 128 lanes for lane-dense stores
    cls_w = w((HIDDEN, NUM_LABELS))
    cls_w_pad = jnp.zeros((HIDDEN, LABEL_PAD), jnp.float32).at[:, :NUM_LABELS].set(cls_w)
    params["cls_w_pad"] = cls_w_pad.astype(jnp.bfloat16)
    params["cls_b_pad"] = jnp.zeros((LABEL_PAD,), jnp.float32)
    return params


# ---------------- forward pass ----------------

def camembert_for_ner(params, input_ids, attention_mask=None, labels=None):
    B, S = input_ids.shape
    M = B * S
    if attention_mask is None:
        attention_mask = jnp.ones((B, S), jnp.float32)
    attention_mask = attention_mask.astype(jnp.float32)

    # --- embeddings (gathers = glue; LayerNorm = Pallas, no zero residual) ---
    not_pad = (input_ids != PAD_IDX).astype(jnp.int32)
    position_ids = jnp.cumsum(not_pad, axis=1) * not_pad + PAD_IDX
    emb = (params["word_emb"][input_ids]
           + params["pos_emb"][position_ids]
           + params["type_emb"][0][None, None, :])
    x = embed_layernorm(emb.reshape(M, HIDDEN),
                        params["emb_ln_g"], params["emb_ln_b"])   # [M, H] bf16
    # hidden_dropout: eval-mode identity

    add_mask = ((1.0 - attention_mask) * -1e9).reshape(B, 1, S)   # additive mask

    for layer in params["layers"]:
        a = attention_block(x.reshape(B, S, HIDDEN),
                            layer["wqkv"], layer["bqkv"],
                            layer["wo"], layer["bo"],
                            add_mask,
                            layer["attn_ln_g"], layer["attn_ln_b"])
        x = ffn_block(a.reshape(M, HIDDEN),
                      layer["w1"], layer["b1"],
                      layer["w2"], layer["b2"],
                      layer["ffn_ln_g"], layer["ffn_ln_b"])

    # --- NER head: dropout (eval identity) + lane-padded classifier ---
    logits_pad = classifier(x, params["cls_w_pad"], params["cls_b_pad"])  # [M,128]
    logits = logits_pad[:, :NUM_LABELS].reshape(B, S, NUM_LABELS)

    loss = None
    if labels is not None:
        loss = cross_entropy(logits_pad, labels.reshape(M))
    return logits, loss


if __name__ == "__main__":
    key = jax.random.PRNGKey(0)
    pkey, ikey, lkey = jax.random.split(key, 3)

    params = init_params(pkey)

    B, S = 2, 8
    input_ids = jax.random.randint(ikey, (B, S), 2, VOCAB)         # avoid pad idx
    attention_mask = jnp.ones((B, S), jnp.float32)
    labels = jax.random.randint(lkey, (B, S), 0, NUM_LABELS)
    labels = labels.at[:, 0].set(-100)                             # some ignored positions

    logits, loss = camembert_for_ner(params, input_ids, attention_mask, labels)
    jax.block_until_ready((logits, loss))

    assert logits.shape == (B, S, NUM_LABELS)
    assert loss.shape == ()
    print("KERNEL_OK")
</pallas_src>

<mosaic_0001>
module attributes {stable_mosaic.version = 11 : i64} {
  func.func @_emb_layernorm_kernel(%arg0: i32, %arg1: memref<16x32xf32, #tpu.memory_space<vmem>>, %arg2: memref<1x32xf32, #tpu.memory_space<vmem>>, %arg3: memref<1x32xf32, #tpu.memory_space<vmem>>, %arg4: memref<16x32xbf16, #tpu.memory_space<vmem>>) attributes {dimension_semantics = [#tpu.dimension_semantics<parallel>], iteration_bounds = array<i64: 1>, scalar_prefetch = 0 : i64, scratch_operands = 0 : i64, tpu.core_type = #tpu.core_type<tc>, window_params = [{transform_indices = @transform_0, window_bounds = array<i64: 16, 32>}, {pipeline_mode = #tpu.pipeline_mode<synchronous>, transform_indices = @transform_1, window_bounds = array<i64: 1, 32>}, {pipeline_mode = #tpu.pipeline_mode<synchronous>, transform_indices = @transform_2, window_bounds = array<i64: 1, 32>}, {transform_indices = @transform_3, window_bounds = array<i64: 16, 32>}]} {
    %c0 = arith.constant 0 : index
    %c0_0 = arith.constant 0 : index
    %0 = vector.load %arg1[%c0, %c0_0] : memref<16x32xf32, #tpu.memory_space<vmem>>, vector<16x32xf32>
    %c0_1 = arith.constant 0 : index
    %c0_2 = arith.constant 0 : index
    %1 = vector.load %arg2[%c0_1, %c0_2] : memref<1x32xf32, #tpu.memory_space<vmem>>, vector<1x32xf32>
    %c0_3 = arith.constant 0 : index
    %c0_4 = arith.constant 0 : index
    %2 = vector.load %arg3[%c0_3, %c0_4] : memref<1x32xf32, #tpu.memory_space<vmem>>, vector<1x32xf32>
    %cst = arith.constant dense<0.000000e+00> : vector<16xf32>
    %3 = vector.multi_reduction <add>, %0, %cst [1] : vector<16x32xf32> to vector<16xf32>
    %4 = vector.shape_cast %3 : vector<16xf32> to vector<16x1xf32>
    %cst_5 = arith.constant 3.200000e+01 : f32
    %5 = vector.broadcast %cst_5 : f32 to vector<16x1xf32>
    %6 = arith.divf %4, %5 : vector<16x1xf32>
    %7 = vector.broadcast %6 : vector<16x1xf32> to vector<16x32xf32>
    %8 = arith.subf %0, %7 : vector<16x32xf32>
    %9 = arith.mulf %8, %8 : vector<16x32xf32>
    %cst_6 = arith.constant dense<0.000000e+00> : vector<16xf32>
    %10 = vector.multi_reduction <add>, %9, %cst_6 [1] : vector<16x32xf32> to vector<16xf32>
    %11 = vector.shape_cast %10 : vector<16xf32> to vector<16x1xf32>
    %cst_7 = arith.constant 3.200000e+01 : f32
    %12 = vector.broadcast %cst_7 : f32 to vector<16x1xf32>
    %13 = arith.divf %11, %12 : vector<16x1xf32>
    %cst_8 = arith.constant 9.99999974E-6 : f32
    %14 = vector.broadcast %cst_8 : f32 to vector<16x1xf32>
    %15 = arith.addf %13, %14 : vector<16x1xf32>
    %16 = math.rsqrt %15 : vector<16x1xf32>
    %17 = vector.broadcast %6 : vector<16x1xf32> to vector<16x32xf32>
    %18 = arith.subf %0, %17 : vector<16x32xf32>
    %19 = vector.broadcast %16 : vector<16x1xf32> to vector<16x32xf32>
    %20 = arith.mulf %18, %19 : vector<16x32xf32>
    %21 = vector.broadcast %1 : vector<1x32xf32> to vector<16x32xf32>
    %22 = arith.mulf %20, %21 : vector<16x32xf32>
    %23 = vector.broadcast %2 : vector<1x32xf32> to vector<16x32xf32>
    %24 = arith.addf %22, %23 : vector<16x32xf32>
    %25 = arith.truncf %24 : vector<16x32xf32> to vector<16x32xbf16>
    %c0_9 = arith.constant 0 : index
    %c0_10 = arith.constant 0 : index
    %26 = vector.load %arg4[%c0_9, %c0_10] : memref<16x32xbf16, #tpu.memory_space<vmem>>, vector<16x32xbf16>
    tpu.vector_store %arg4[%c0_9, %c0_10], %25 {strides = array<i32>} : memref<16x32xbf16, #tpu.memory_space<vmem>>, vector<16x32xbf16>,
    return
  }
  func.func @transform_0(%arg0: i32) -> (i32, i32) {
    %c0_i32 = arith.constant 0 : i32
    %c0_i32_0 = arith.constant 0 : i32
    return %arg0, %c0_i32 : i32, i32
  }
  func.func @transform_1(%arg0: i32) -> (i32, i32) {
    %c0_i32 = arith.constant 0 : i32
    %c0_i32_0 = arith.constant 0 : i32
    %c0_i32_1 = arith.constant 0 : i32
    return %c0_i32, %c0_i32_0 : i32, i32
  }
  func.func @transform_2(%arg0: i32) -> (i32, i32) {
    %c0_i32 = arith.constant 0 : i32
    %c0_i32_0 = arith.constant 0 : i32
    %c0_i32_1 = arith.constant 0 : i32
    return %c0_i32, %c0_i32_0 : i32, i32
  }
  func.func @transform_3(%arg0: i32) -> (i32, i32) {
    %c0_i32 = arith.constant 0 : i32
    %c0_i32_0 = arith.constant 0 : i32
    return %arg0, %c0_i32 : i32, i32
  }
}

</mosaic_0001>

<bundles_post_ra>
// kernel: tpu_custom_call.1
= control target key start
LH: loop header
LB: loop body
LE: loop exit
PB: predicated region body
PF: predicated region fallthrough
CT: control target
= control target key end

     0   :  { %8 = vsyncpa [#allocation3], 0  ;;  %s274_s0 = inlined_call_operand.hbm [shape: f32[16,32], index: 0, kind: input, shape index: {}]   ;;  %s275_s1 = inlined_call_operand.hbm [shape: f32[1,32], index: 1, kind: input, shape index: {}]   ;;  %s276_s2 = inlined_call_operand.vmem [shape: f32[1,32], index: 2, kind: input, shape index: {}]   ;;  %s277_s3 = inlined_call_operand.hbm [shape: bf16[16,32], index: 3, kind: output, shape index: {}]  }
   0x1   :  { %9 = vsyncpa [#allocation6], 0 }
   0x2   :  { %10 = vsyncpa [#allocation4], 0  ;;  %s15_s14 = sshll.u32 %s274_s0, 4  ;;  %s230_s15 = smov [#allocation2]   ;;  %s16_s14 = int_to_ptr.hbm [resolvable:$true] %s15_s14 }
   0x3   :  { %s17_s16 = sshll.u32 %s230_s15, 4  ;;  %s29_s19 = sshll.u32 %s275_s1, 4  ;;  %s18_s16 = int_to_ptr.vmem [resolvable:$true] %s17_s16  ;;  %s30_s19 = int_to_ptr.hbm [resolvable:$true] %s29_s19 }
   0x4   :  { %s231_s20 = smov 128   ;;  %s232_s21 = smov 8  }
   0x5   :  { %23 = dma.hbm_to_vmem [thread:$0]  %s16_s14, 256, %s18_s16, [#allocation3], %s231_s20, %s231_s20, %s232_s21  }
   0x6   :  { %s233_s22 = smov [#allocation5]  }
   0x7   :  { %s31_s23 = sshll.u32 %s233_s22, 4  ;;  %s32_s23 = int_to_ptr.vmem [resolvable:$true] %s31_s23 }
   0x8   :  { %34 = dma.hbm_to_vmem [thread:$0]  %s30_s19, 16, %s32_s23, [#allocation6]  }
   0x9   :  { %224 = dma.done.wait [#allocation3], 256  }
   0xa   :  { %225 = vsyncadd [#allocation3], 4294967040 }
   0xb   :  { %226 = dma.done.wait [#allocation6], 16  }
   0xc   :  { %227 = vsyncadd [#allocation6], 4294967280  ;;  %vm49_vm0 = vcmask 261120   ;;  %v45_v0 = vld [vmem:[#allocation2] sm:$0xff]  ;;  %v46_v2 = vld [vmem:[#allocation2 + $0x8] sm:$0xff]  ;;  %v234_v4 = vmov 32.0  }
   0xd   :  { %v50_v1 = vsel %vm49_vm0, %v45_v0, 0.0  ;;  %v53_v3 = vsel %vm49_vm0, %v46_v2, 0.0  ;;  %146 = vrcp.f32 %v234_v4  ;;  %v144_v35 = vld [vmem:[#allocation5] ss:$0 sm:$0xff]  ;;  %v145_v38 = vld [vmem:[%s276_s2] ss:$0 sm:$0xff] }
   0xe   :  { %51 = vadd.xlane.f32.xlu0 %v50_v1  ;;  %vm113_vm7 = vcmask 257024   ;;  %s235_s24 = smov [#allocation7]   ;;  %s122_s2 = sshll.u32 %s277_s3, 4  ;;  %s123_s2 = int_to_ptr.hbm [resolvable:$true] %s122_s2 }
   0xf   :  { %s120_s25 = sshll.u32 %s235_s24, 4  ;;  %s236_s28 = smov 64   ;;  %s121_s25 = int_to_ptr.vmem [resolvable:$true] %s120_s25 }
  0x10   :  { %s237_s29 = smov 4  }
  0x13   :  { %v147_v5 = vpop.eup %146 }
  0x14   :  { %v57_v6 = vmul.f32 32.0, %v147_v5  ;;  %vm61_vm1 = vweird.f32 %v147_v5 }
  0x16   :  { %54 = vadd.xlane.f32.xlu0 %v53_v3  ;;  %v58_v7 = vsub.f32 1.0, %v57_v6 }
  0x18   :  { %v59_v8 = vmul.f32 %v147_v5, %v58_v7 }
  0x1a   :  { %v60_v9 = vadd.f32 %v147_v5, %v59_v8 }
  0x1c   :  { %v62_v10 = vsel %vm61_vm1, %v147_v5, %v60_v9 }
  0x81   :  { %v52_v11 = vpop.xlane.xlu0 %51 }
  0x82   :  { %v63_v12 = vmul.f32 %v62_v10, %v52_v11 }
  0x84   :  { %v65_v13 = vsub.f32 %v45_v0, %v63_v12 }
  0x86   :  { %v67_v14 = vmul.f32 %v65_v13, %v65_v13 }
  0x88   :  { %v69_v15 = vsel %vm49_vm0, %v67_v14, 0.0 }
  0x89   :  { %70 = vadd.xlane.f32.xlu1 %v69_v15  ;;  %v55_v16 = vpop.xlane.xlu0 %54 }
  0x8a   :  { %v64_v17 = vmul.f32 %v62_v10, %v55_v16 }
  0x8c   :  { %v66_v18 = vsub.f32 %v46_v2, %v64_v17 }
  0x8e   :  { %v68_v19 = vmul.f32 %v66_v18, %v66_v18 }
  0x90   :  { %v72_v20 = vsel %vm49_vm0, %v68_v19, 0.0 }
  0x91   :  { %73 = vadd.xlane.f32.xlu1 %v72_v20 }
  0xfc   :  { %v71_v21 = vpop.xlane.xlu1 %70 }
  0xfd   :  { %v75_v22 = vmul.f32 %v71_v21, %v62_v10 }
  0xff   :  { %v77_v23 = vadd.f32 1e-05, %v75_v22 }
 0x101   :  { %148 = vrsqrt.f32 %v77_v23  ;;  %vm85_vm3 = vweird.f32 %v77_v23 }
 0x104   :  { %v74_v24 = vpop.xlane.xlu1 %73 }
 0x105   :  { %v76_v25 = vmul.f32 %v74_v24, %v62_v10 }
 0x107   :  { %v149_v26 = vpop.eup %148  ;;  %v78_v27 = vadd.f32 1e-05, %v76_v25 }
 0x108   :  { %v80_v28 = vmul.f32 %v149_v26, %v77_v23  ;;  %vm86_vm2 = vweird.f32 %v149_v26 }
 0x109   :  { %150 = vrsqrt.f32 %v78_v27  ;;  %vm87_vm4 = vmor %vm85_vm3, %vm86_vm2  ;;  %vm95_vm6 = vweird.f32 %v78_v27 }
 0x10a   :  { %v81_v29 = vmul.f32 %v149_v26, %v80_v28 }
 0x10c   :  { %v82_v30 = vmul.f32 0.5, %v81_v29 }
 0x10e   :  { %v83_v31 = vsub.f32 1.5, %v82_v30 }
 0x10f   :  { %v151_v32 = vpop.eup %150 }
 0x110   :  { %v84_v33 = vmul.f32 %v149_v26, %v83_v31  ;;  %v90_v34 = vmul.f32 %v151_v32, %v78_v27  ;;  %vm96_vm5 = vweird.f32 %v151_v32 }
 0x111   :  { %vm97_vm8 = vmor %vm95_vm6, %vm96_vm5 }
 0x112   :  { %v88_v36 = vsel %vm87_vm4, %v149_v26, %v84_v33  ;;  %v91_v37 = vmul.f32 %v151_v32, %v90_v34 }
 0x113   :  { %v99_v39 = vmul.f32 %v88_v36, %v65_v13 }
 0x114   :  { %v92_v40 = vmul.f32 0.5, %v91_v37 }
 0x115   :  { %v104_v41 = vmul.f32 %v144_v35, %v99_v39 }
 0x116   :  { %v93_v42 = vsub.f32 1.5, %v92_v40 }
 0x117   :  { %v109_v43 = vadd.f32 %v145_v38, %v104_v41 }
 0x118   :  { %v94_v44 = vmul.f32 %v151_v32, %v93_v42 }
 0x119   :  { %v111_v45 = vpack.c.bf16 %v109_v43, %v109_v43 }
 0x11a   :  { %v98_v46 = vsel %vm97_vm8, %v151_v32, %v94_v44 }
 0x11b   :  { %v100_v47 = vmul.f32 %v98_v46, %v66_v18  ;;  %114 = vst.msk [vmem:[#allocation7] sm:$0xf] %vm113_vm7, %v111_v45 }
 0x11d   :  { %v105_v48 = vmul.f32 %v144_v35, %v100_v47 }
 0x11f   :  { %v110_v49 = vadd.f32 %v145_v38, %v105_v48 }
 0x121   :  { %v112_v50 = vpack.c.bf16 %v110_v49, %v110_v49 }
 0x123   :  { %115 = vst.msk [vmem:[#allocation7 + $0x4] sm:$0xf] %vm113_vm7, %v112_v50 }
 0x124   :  { %128 = dma.vmem_to_hbm [thread:$0]  %s121_s25, 128, %s123_s2, [#allocation4], %s236_s28, %s236_s28, %s237_s29  }
 0x125   :  { %228 = dma.done.wait [#allocation4], 128  }
 0x126   :  { %229 = vsyncadd [#allocation4], 4294967168 }
 0x127   :  { %133 = vsyncpa [#allocation3], 1 }
 0x128   :  { %134 = vsyncpa [#allocation6], 1 }
 0x129   :  { %135 = vsyncpa [#allocation4], 1 }

</bundles_post_ra>
